<compile_context>
chip_gen: v6e
topology: v6e:2x2x1
jax: 0.10.0
libtpu: 0.0.40
codegen_flags: <defaults>
</compile_context>

<pallas_src>
import functools

import numpy as np

import jax
import jax.numpy as jnp
from jax import lax
from jax.experimental import pallas as pl
from jax.experimental.pallas import tpu as pltpu


def _basic_conv_kernel(x_ref, w_ref, scale_ref, bias_ref, o_ref, *,
                       H, Ho, WoC, P, KH):
    """One image per grid step.

    x_ref    : (1, H, W*Cin)        bf16 input rows (un-padded)
    w_ref    : (W*Cin, KH*Wo*Cout)  bf16 banded conv weights
    scale_ref, bias_ref : (1, Wo*Cout) f32 folded BN scale / bias (tiled over Wo)
    o_ref    : (1, Ho, Wo*Cout)     f32 output (flat, lane-dense)
    """
    x = x_ref[0]                                             # (H, W*Cin) bf16

    # Single MXU matmul: every (kw, ci) tap lives in the banded weight columns;
    # the KH row taps are contiguous 128-aligned column blocks of the result.
    m_all = jnp.dot(x, w_ref[...],
                    preferred_element_type=jnp.float32)      # (H, KH*WoC) f32

    acc = jnp.zeros((Ho, WoC), jnp.float32)
    for kh in range(KH):
        m = m_all[:, kh * WoC:(kh + 1) * WoC]                # lane-aligned slice
        # Output row h accumulates input row h + kh - P (zero outside [0, H)).
        lo = max(0, P - kh)
        hi = min(Ho, H + P - kh)
        if hi <= lo:
            continue
        src = m[lo + kh - P: hi + kh - P]                    # (hi-lo, WoC)
        parts = []
        if lo > 0:
            parts.append(jnp.zeros((lo, WoC), jnp.float32))
        parts.append(src)
        if Ho - hi > 0:
            parts.append(jnp.zeros((Ho - hi, WoC), jnp.float32))
        shifted = jnp.concatenate(parts, axis=0) if len(parts) > 1 else src
        acc = acc + shifted

    # Folded BatchNorm (eval mode) + ReLU, fused, f32 epilogue, lane-dense store.
    y = acc * scale_ref[...] + bias_ref[...]
    o_ref[0] = jnp.maximum(y, 0.0)


def _build_banded_weight(w_hwio, W, Wo, padding, dtype):
    """Fold the KW taps and implicit W zero-padding into a banded matmul weight.

    Returns (W*Cin, KH*Wo*Cout): for output column (kh, wo, co) the band holds
    w[kh, kw, :, co] at input rows wi*Cin:(wi+1)*Cin with wi = wo + kw - padding
    (entries outside [0, W) are simply absent == implicit zero padding).
    Built once on host; tiny (KB-scale) for realistic W.
    """
    KH, KW, Cin, Cout = w_hwio.shape
    w_np = np.asarray(w_hwio, np.float32)
    band = np.zeros((KH, W * Cin, Wo * Cout), np.float32)
    for kh in range(KH):
        for kw in range(KW):
            for wo in range(Wo):
                wi = wo + kw - padding
                if 0 <= wi < W:
                    band[kh, wi * Cin:(wi + 1) * Cin,
                         wo * Cout:(wo + 1) * Cout] = w_np[kh, kw]
    band = np.transpose(band, (1, 0, 2)).reshape(W * Cin, KH * Wo * Cout)
    return jnp.asarray(band, dtype)


def basic_conv(x_nhwc, w_hwio, bn_scale, bn_bias, *, padding=1, stride=1):
    """BasicConv forward. Only stride=1, dilation=1, groups=1 supported here."""
    assert stride == 1, "this synthetic kernel implements stride=1"
    N, H, W, Cin = x_nhwc.shape
    KH, KW, _, Cout = w_hwio.shape
    Ho = H + 2 * padding - KH + 1
    Wo = W + 2 * padding - KW + 1
    WoC = Wo * Cout

    # bf16 matmul inputs (native MXU rate, half the HBM/VMEM traffic);
    # accumulation and the BN/ReLU epilogue stay f32 inside the kernel.
    x_rows = x_nhwc.astype(jnp.bfloat16).reshape(N, H, W * Cin)
    w_band = _build_banded_weight(w_hwio, W, Wo, padding, jnp.bfloat16)

    # Folded BN scale/bias tiled over Wo so it lines up with the flat output.
    scale2d = jnp.tile(bn_scale.astype(jnp.float32), Wo).reshape(1, WoC)
    bias2d = jnp.tile(bn_bias.astype(jnp.float32), Wo).reshape(1, WoC)

    kernel = functools.partial(_basic_conv_kernel,
                               H=H, Ho=Ho, WoC=WoC, P=padding, KH=KH)

    out_flat = pl.pallas_call(
        kernel,
        out_shape=jax.ShapeDtypeStruct((N, Ho, WoC), jnp.float32),
        grid_spec=pltpu.PrefetchScalarGridSpec(
            num_scalar_prefetch=0,
            grid=(N,),
            in_specs=[
                pl.BlockSpec((1, H, W * Cin), lambda n: (n, 0, 0)),
                pl.BlockSpec((W * Cin, KH * WoC), lambda n: (0, 0)),
                pl.BlockSpec((1, WoC), lambda n: (0, 0)),
                pl.BlockSpec((1, WoC), lambda n: (0, 0)),
            ],
            out_specs=pl.BlockSpec((1, Ho, WoC), lambda n: (n, 0, 0)),
        ),
        compiler_params=pltpu.CompilerParams(
            dimension_semantics=("parallel",),
            vmem_limit_bytes=32 * 1024 * 1024,
        ),
    )(x_rows, w_band, scale2d, bias2d)

    # Un-flatten the lane-dense flat output back to NHWC (wrapper glue).
    return out_flat.reshape(N, Ho, Wo, Cout)


def reference(x_nhwc, w_hwio, bn_scale, bn_bias, *, padding=1):
    y = lax.conv_general_dilated(
        x_nhwc, w_hwio, window_strides=(1, 1),
        padding=[(padding, padding), (padding, padding)],
        dimension_numbers=("NHWC", "HWIO", "NHWC"))
    y = y * bn_scale[None, None, None, :] + bn_bias[None, None, None, :]
    return jnp.maximum(y, 0.0)


if __name__ == "__main__":
    # BasicConv(in_planes=4, out_planes=8, kernel_size=3, padding=1,
    #           relu=True, bn=True, bias=False)
    N, Cin, H, W = 2, 4, 16, 16
    Cout, K, pad = 8, 3, 1
    eps = 1e-5

    key = jax.random.PRNGKey(0)
    kx, kw, kg, kb, km, kv = jax.random.split(key, 6)

    # PyTorch input is NCHW; transpose to our NHWC layout (glue).
    x_nchw = jax.random.normal(kx, (N, Cin, H, W), dtype=jnp.float32)
    x_nhwc = jnp.transpose(x_nchw, (0, 2, 3, 1))

    # Conv weight: PyTorch shape (Cout, Cin, KH, KW) -> HWIO.
    w_oihw = jax.random.normal(kw, (Cout, Cin, K, K), dtype=jnp.float32) * 0.1
    w_hwio = jnp.transpose(w_oihw, (2, 3, 1, 0))

    # BatchNorm2d params / running stats (deterministic, eval-mode fold).
    gamma = 1.0 + 0.1 * jax.random.normal(kg, (Cout,), dtype=jnp.float32)
    beta = 0.1 * jax.random.normal(kb, (Cout,), dtype=jnp.float32)
    running_mean = 0.1 * jax.random.normal(km, (Cout,), dtype=jnp.float32)
    running_var = jnp.abs(jax.random.normal(kv, (Cout,), dtype=jnp.float32)) + 0.5

    bn_scale = gamma / jnp.sqrt(running_var + eps)
    bn_bias = beta - running_mean * bn_scale

    y = basic_conv(x_nhwc, w_hwio, bn_scale, bn_bias, padding=pad)
    y = jax.block_until_ready(y)

    y_ref = reference(x_nhwc, w_hwio, bn_scale, bn_bias, padding=pad)
    assert y.shape == (N, H, W, Cout)
    # Kernel uses bf16 conv inputs (f32 accumulate); allow bf16-level error
    # versus the pure-f32 reference.
    assert jnp.allclose(y, y_ref, atol=5e-2, rtol=5e-2), "mismatch vs JAX reference"

    print("KERNEL_OK")
</pallas_src>

<mosaic_0001>
module attributes {stable_mosaic.version = 11 : i64} {
  func.func @_basic_conv_kernel(%arg0: i32, %arg1: memref<1x16x64xbf16, #tpu.memory_space<vmem>>, %arg2: memref<64x384xbf16, #tpu.memory_space<vmem>>, %arg3: memref<1x128xf32, #tpu.memory_space<vmem>>, %arg4: memref<1x128xf32, #tpu.memory_space<vmem>>, %arg5: memref<1x16x128xf32, #tpu.memory_space<vmem>>) attributes {dimension_semantics = [#tpu.dimension_semantics<parallel>], iteration_bounds = array<i64: 2>, scalar_prefetch = 0 : i64, scratch_operands = 0 : i64, tpu.core_type = #tpu.core_type<tc>, window_params = [{transform_indices = @transform_0, window_bounds = array<i64: 1, 16, 64>}, {pipeline_mode = #tpu.pipeline_mode<synchronous>, transform_indices = @transform_1, window_bounds = array<i64: 64, 384>}, {pipeline_mode = #tpu.pipeline_mode<synchronous>, transform_indices = @transform_2, window_bounds = array<i64: 1, 128>}, {pipeline_mode = #tpu.pipeline_mode<synchronous>, transform_indices = @transform_3, window_bounds = array<i64: 1, 128>}, {transform_indices = @transform_4, window_bounds = array<i64: 1, 16, 128>}]} {
    %c0 = arith.constant 0 : index
    %c0_0 = arith.constant 0 : index
    %c0_1 = arith.constant 0 : index
    %0 = vector.load %arg1[%c0, %c0_0, %c0_1] : memref<1x16x64xbf16, #tpu.memory_space<vmem>>, vector<1x16x64xbf16>
    %1 = vector.shape_cast %0 : vector<1x16x64xbf16> to vector<16x64xbf16>
    %c0_2 = arith.constant 0 : index
    %c0_3 = arith.constant 0 : index
    %2 = vector.load %arg2[%c0_2, %c0_3] : memref<64x384xbf16, #tpu.memory_space<vmem>>, vector<64x384xbf16>
    %cst = arith.constant dense<0.000000e+00> : vector<16x384xf32>
    %3 = tpu.matmul %1, %2, %cst {dimension_numbers = #tpu.dot_dimension_numbers<[1], [0], [0], [1], [0, 0, 1, 1], [], []>} : vector<16x64xbf16>, vector<64x384xbf16>, vector<16x384xf32> -> vector<16x384xf32>
    %cst_4 = arith.constant 0.000000e+00 : f32
    %4 = vector.broadcast %cst_4 : f32 to vector<16x128xf32>
    %5 = vector.extract_strided_slice %3 {offsets = [0, 0], sizes = [16, 128], strides = [1, 1]} : vector<16x384xf32> to vector<16x128xf32>
    %6 = vector.extract_strided_slice %5 {offsets = [0, 0], sizes = [15, 128], strides = [1, 1]} : vector<16x128xf32> to vector<15x128xf32>
    %cst_5 = arith.constant 0.000000e+00 : f32
    %7 = vector.broadcast %cst_5 : f32 to vector<1x128xf32>
    %8 = tpu.concatenate %7, %6 in 0 : vector<1x128xf32>, vector<15x128xf32> -> vector<16x128xf32>
    %9 = arith.addf %4, %8 : vector<16x128xf32>
    %10 = vector.extract_strided_slice %3 {offsets = [0, 128], sizes = [16, 128], strides = [1, 1]} : vector<16x384xf32> to vector<16x128xf32>
    %11 = arith.addf %9, %10 : vector<16x128xf32>
    %12 = vector.extract_strided_slice %3 {offsets = [0, 256], sizes = [16, 128], strides = [1, 1]} : vector<16x384xf32> to vector<16x128xf32>
    %13 = vector.extract_strided_slice %12 {offsets = [1, 0], sizes = [15, 128], strides = [1, 1]} : vector<16x128xf32> to vector<15x128xf32>
    %cst_6 = arith.constant 0.000000e+00 : f32
    %14 = vector.broadcast %cst_6 : f32 to vector<1x128xf32>
    %15 = tpu.concatenate %13, %14 in 0 : vector<15x128xf32>, vector<1x128xf32> -> vector<16x128xf32>
    %16 = arith.addf %11, %15 : vector<16x128xf32>
    %c0_7 = arith.constant 0 : index
    %c0_8 = arith.constant 0 : index
    %17 = vector.load %arg3[%c0_7, %c0_8] : memref<1x128xf32, #tpu.memory_space<vmem>>, vector<1x128xf32>
    %18 = vector.broadcast %17 : vector<1x128xf32> to vector<16x128xf32>
    %19 = arith.mulf %16, %18 : vector<16x128xf32>
    %c0_9 = arith.constant 0 : index
    %c0_10 = arith.constant 0 : index
    %20 = vector.load %arg4[%c0_9, %c0_10] : memref<1x128xf32, #tpu.memory_space<vmem>>, vector<1x128xf32>
    %21 = vector.broadcast %20 : vector<1x128xf32> to vector<16x128xf32>
    %22 = arith.addf %19, %21 : vector<16x128xf32>
    %cst_11 = arith.constant 0.000000e+00 : f32
    %23 = vector.broadcast %cst_11 : f32 to vector<16x128xf32>
    %24 = arith.maximumf %22, %23 : vector<16x128xf32>
    %c0_12 = arith.constant 0 : index
    %c0_13 = arith.constant 0 : index
    %c0_14 = arith.constant 0 : index
    %25 = vector.load %arg5[%c0_12, %c0_13, %c0_14] : memref<1x16x128xf32, #tpu.memory_space<vmem>>, vector<1x16x128xf32>
    %26 = vector.shape_cast %25 : vector<1x16x128xf32> to vector<16x128xf32>
    %27 = vector.shape_cast %24 : vector<16x128xf32> to vector<1x16x128xf32>
    tpu.vector_store %arg5[%c0_12, %c0_13, %c0_14], %27 {strides = array<i32>} : memref<1x16x128xf32, #tpu.memory_space<vmem>>, vector<1x16x128xf32>,
    return
  }
  func.func @transform_0(%arg0: i32) -> (i32, i32, i32) {
    %c0_i32 = arith.constant 0 : i32
    %c0_i32_0 = arith.constant 0 : i32
    %c0_i32_1 = arith.constant 0 : i32
    return %arg0, %c0_i32, %c0_i32_0 : i32, i32, i32
  }
  func.func @transform_1(%arg0: i32) -> (i32, i32) {
    %c0_i32 = arith.constant 0 : i32
    %c0_i32_0 = arith.constant 0 : i32
    %c0_i32_1 = arith.constant 0 : i32
    return %c0_i32, %c0_i32_0 : i32, i32
  }
  func.func @transform_2(%arg0: i32) -> (i32, i32) {
    %c0_i32 = arith.constant 0 : i32
    %c0_i32_0 = arith.constant 0 : i32
    %c0_i32_1 = arith.constant 0 : i32
    return %c0_i32, %c0_i32_0 : i32, i32
  }
  func.func @transform_3(%arg0: i32) -> (i32, i32) {
    %c0_i32 = arith.constant 0 : i32
    %c0_i32_0 = arith.constant 0 : i32
    %c0_i32_1 = arith.constant 0 : i32
    return %c0_i32, %c0_i32_0 : i32, i32
  }
  func.func @transform_4(%arg0: i32) -> (i32, i32, i32) {
    %c0_i32 = arith.constant 0 : i32
    %c0_i32_0 = arith.constant 0 : i32
    %c0_i32_1 = arith.constant 0 : i32
    return %arg0, %c0_i32, %c0_i32_0 : i32, i32, i32
  }
}

</mosaic_0001>

<bundles_post_ra>
// kernel: tpu_custom_call.1
= control target key start
LH: loop header
LB: loop body
LE: loop exit
PB: predicated region body
PF: predicated region fallthrough
CT: control target
= control target key end

     0   :  { %9 = vsyncpa [#allocation3], 0  ;;  %s1035_s0 = inlined_call_operand.hbm [shape: bf16[2,16,64], index: 0, kind: input, shape index: {}]   ;;  %s1036_s1 = inlined_call_operand.hbm [shape: bf16[64,384], index: 1, kind: input, shape index: {}]   ;;  %s1037_s2 = inlined_call_operand.vmem [shape: f32[1,128], index: 2, kind: input, shape index: {}]   ;;  %s1038_s3 = inlined_call_operand.vmem [shape: f32[1,128], index: 3, kind: input, shape index: {}]   ;;  %s1039_s4 = inlined_call_operand.hbm [shape: f32[2,16,128], index: 4, kind: output, shape index: {}]  }
   0x1   :  { %11 = vsyncpa [#allocation3 + $0x1], 0 }
   0x2   :  { %12 = vsyncpa [#allocation6], 0 }
   0x3   :  { %13 = vsyncpa [#allocation4], 0 }
   0x4   :  { %15 = vsyncpa [#allocation4 + $0x1], 0  ;;  %s846_s15 = smov 0   ;;  %s848_s16 = smov 0  }
   0x5   :  { %s850_s17 = smov 0   ;;  %s852_s18 = smov 0  }
   0x6 LB: > { %s867_s19 = sadd.s32 4294967295, %s807_s18   ;;  %s550_s20 = sadd.s32 4294967294, %s807_s18   ;;  %s807_s18 = sphi %s852_s18, %s1061_s18   ;;  %s803_s17 = sphi %s850_s17, %s1060_s17   ;;  %s799_s16 = sphi %s848_s16, %s1059_s16   ;;  %s795_s15 = sphi %s846_s15, %s1058_s15  }
   0x7   : > { %p41_p0 = scmp.ne.s32.totalorder %s799_s16, %s795_s15  ;;  %p1040_p1 = scmp.eq.s32.totalorder %s867_s19, 0 }
   0x8   : > { %p134_p3 = scmp.eq.s32.totalorder %s550_s20, 1  ;;  %p551_p5 = scmp.ge.s32.totalorder %s807_s18, 1 }
   0x9   : > { %p876_p4 = por %p1040_p1, %p41_p0  ;;  %p141_p7 = scmp.lt.s32.totalorder %s807_s18, 3 }
   0xa   : > { %p881_p6 = por %p134_p3, %p41_p0  ;;  %s809_s24 = smov [#allocation5]  }
   0xb   : > { %s1044_s21 = scalar_select %p876_p4, 1, 0 }
   0xc   : > { %s1045_s22 = scalar_select %p881_p6, 1, 0 }
   0xd   : > { %p886_p8 = pnand %p551_p5, %p141_p7  ;;  %s153_s25 = sshll.u32 %s809_s24, 4  ;;  %s154_s25 = int_to_ptr.vmem [resolvable:$true] %s153_s25 }
   0xe   : > { %s900_s27 = sadd.s32 1, %s807_s18   ;;  %s28_s28 = sadd.s32 1, %s803_s17 }
   0xf   : > { %s1046_s23 = scalar_select %p886_p8, 1, 0 }
  0x10   : > { %p610_p9 = pneg %p886_p8  ;;  %s25_s29 = ssub.s32 %s807_s18, %s900_s27 }
  0x11   : > { %s696_s30 = scalar_lea.vmem %s154_s25, 1536  ;;  %p704_p5 = scmp.lt.s32.totalorder %s154_s25, %s154_s25 }
  0x12   : > { %p895_p11 = pnand %p610_p9, %p1040_p1  ;;  %p697_p13 = scmp.ne.s32.totalorder %s154_s25, %s696_s30 }
  0x13   : > { %p705_p7 = scmp.lt.s32.totalorder %s696_s30, %s696_s30 }
  0x14   : > { %p687_p12 = pneg %p895_p11 }
  0x15   : > { %p706_p10 = por %p705_p7, %p704_p5 }
  0x16   : > { %p699_p0 = pnand %p697_p13, %p687_p12 }
  0x18   : > { %p700_p3 = pneg %p699_p0 }
  0x1a   : > { %p707_p2 = pnand %p706_p10, %p700_p3 }
  0x1c   : > { %710 = shalt.err (!%p707_p2)
}
  0x1d   : > { %s810_s5 = smov 192   ;;  %s811_s6 = smov 12  }
  0x1e   : > { %613 = dma.hbm_to_vmem [thread:$0]  (!%p895_p11), %s1036_s1, 1536, %s154_s25, [#allocation6], %s810_s5, %s810_s5, %s811_s6  }
  0x1f   : > { %p26_p9 = scmp.eq.s32.totalorder %s25_s29, 0  ;;  %p35_p12 = scmp.ne.s32.totalorder %s803_s17, %s799_s16 }
  0x20   : > { %p36_p10 = scmp.eq.s32.totalorder %s807_s18, 0  ;;  %p623_p2 = scmp.lt.s32.totalorder %s807_s18, 2 }
  0x21   : > { %s917_s9 = scalar_select %p26_p9, %s803_s17, %s28_s28  }
  0x22   : > { %p37_p13 = por %p36_p10, %p35_p12  ;;  %p1048_p0 = scmp.eq.s32.totalorder %s867_s19, 1 }
  0x23   : > { %s173_s11 = sand.u32 1, %s803_s17   ;;  %s583_s12 = sshll.u32 %s807_s18, 7 }
  0x24   : > { %p921_p3 = por %p1048_p0, %p35_p12  ;;  %s554_s13 = sshll.u32 %s173_s11, 3 }
  0x25   : > { %s930_s24 = scalar_lea.hbm %s1035_s0, %s583_s12  ;;  %s177_s25 = scalar_lea.vmem [#allocation2], %s554_s13 }
  0x26   : > { %s1049_s10 = scalar_select %p921_p3, 1, 0 }
  0x27   : > { %s184_s26 = sshll.u32 %s177_s25, 4  ;;  %p932_p11 = pnand %p623_p2, %p37_p13  ;;  %s936_s26 = int_to_ptr.vmem [resolvable:$true] %s184_s26 }
  0x28   : > { %s938_s29 = scalar_lea.sflag [#allocation3], %s173_s11  ;;  %s711_s30 = scalar_lea.hbm %s930_s24, 128 }
  0x29   : > { %p712_p5 = scmp.ne.s32.totalorder %s930_s24, %s711_s30  ;;  %p713_p7 = pneg %p932_p11 }
  0x2a   : > { %s716_s7 = scalar_lea.hbm %s1035_s0, 256  ;;  %p717_p10 = scmp.lt.s32.totalorder %s930_s24, %s1035_s0 }
  0x2b   : > { %p714_p9 = pnand %p713_p7, %p712_p5  ;;  %p718_p2 = scmp.lt.s32.totalorder %s716_s7, %s711_s30 }
  0x2d   : > { %p715_p12 = pneg %p714_p9  ;;  %p719_p13 = por %p718_p2, %p717_p10 }
  0x2f   : > { %p720_p0 = pnand %p719_p13, %p715_p12 }
  0x31   : > { %723 = shalt.err (!%p720_p0)
}
  0x32   : > { %s724_s11 = scalar_lea.vmem %s936_s26, 128  ;;  %s812_s13 = smov [#allocation2]  }
  0x33   : > { %p725_p1 = scmp.ne.s32.totalorder %s936_s26, %s724_s11  ;;  %s729_s14 = sshll.u32 %s812_s13, 4  ;;  %s730_s14 = int_to_ptr.vmem [resolvable:$false] %s729_s14 }
  0x34   : > { %s731_s20 = scalar_lea.vmem %s730_s14, 256  ;;  %p732_p9 = scmp.lt.s32.totalorder %s936_s26, %s730_s14 }
  0x35   : > { %p727_p6 = pnand %p725_p1, %p713_p7  ;;  %p733_p3 = scmp.lt.s32.totalorder %s731_s20, %s724_s11 }
  0x37   : > { %p728_p5 = pneg %p727_p6  ;;  %p734_p4 = por %p733_p3, %p732_p9 }
  0x39   : > { %p735_p8 = pnand %p734_p4, %p728_p5 }
  0x3b   : > { %738 = shalt.err (!%p735_p8)
}
  0x3c   : > { %s813_s25 = smov 64   ;;  %s814_s30 = smov 4  }
  0x3d   : > { %617 = dma.hbm_to_vmem [thread:$0]  (!%p932_p11), %s930_s24, 128, %s936_s26, %s938_s29, %s813_s25, %s813_s25, %s814_s30  }
  0x3e   : > { %p1051_p1 = scmp.ne.s32.totalorder %s1046_s23, 0 }
  0x3f   : > { %s962_s5 = sand.u32 (!%p1051_p1), 1, %s799_s16   ;;  %p1052_p4 = scmp.ne.s32.totalorder (!%p1051_p1), %s1044_s21, 0 }
  0x40   : > { %196 = sbr.rel (%p1051_p1) target bundleno = 315 (0x13b), region = 36  ;;  %s558_s6 = sshll.u32 (!%p1051_p1), %s962_s5, 3 }
  0x41   : > { %s199_s7 = scalar_lea.sflag (!%p1051_p1), [#allocation3], %s962_s5  ;;  %s966_s8 = scalar_lea.vmem (!%p1051_p1), [#allocation2], %s558_s6 }
  0x45   : > { %782 = dma.done.wait (%p1052_p4), %s199_s7, 128  }
  0x46   : > { %784 = vsyncadd (%p1052_p4), %s199_s7, 4294967168  ;;  %p1053_p6 = scmp.eq.s32.totalorder %s867_s19, 0 }
  0x48   : > { %786 = dma.done.wait (%p1053_p6), [#allocation6], 1536   ;;  %p1054_p8 = pmov %p1053_p6 }
  0x49   : > { %v815_v0 = vmov 0.0   ;;  %vm816_vm0 = vmmov 0   ;;  %v817_v1 = vmov 0   ;;  %v668_v2 = vld [vmem:[#allocation5 + $0x4c] ss:$12 sps:$4 sm:$0xff]   ;;  %vm319_vm1 = vcmask 523264  }
  0x4a   : > { %788 = vsyncadd (%p1054_p8), [#allocation6], 4294965760  ;;  %590 = vmatprep.subr.bf16.mxu1 %v815_v0  ;;  %598 = vmatprep.mubr.msk.bf16.mxu1 %vm816_vm0, %v815_v0  ;;  %v670_v3 = vld [vmem:[#allocation5 + $0x50] ss:$12 sps:$4 sm:$0xff]   ;;  %v671_v4 = vld [vmem:[#allocation5 + $0x48] ss:$12 sps:$4 sm:$0xff]  }
  0x4b   : > { %355 = vmatprep.mubr.bf16.mxu0 %v817_v1  ;;  %331 = vmatprep.subr.bf16.mxu0 %v668_v2  ;;  %v672_v5 = vld [vmem:[#allocation5 + $0x34] ss:$12 sps:$4 sm:$0xff]   ;;  %v674_v6 = vld [vmem:[#allocation5 + $0x38] ss:$12 sps:$4 sm:$0xff]   ;;  %v675_v7 = vld [vmem:[#allocation5 + $0x30] ss:$12 sps:$4 sm:$0xff]  }
  0x4c   : > { %591 = vmatpush3.bf16.msra.mxu1 %v670_v3  ;;  %332 = vmatpush1.bf16.msra.mxu0 %v671_v4  ;;  %v676_v8 = vld [vmem:[#allocation5 + $0x1c] ss:$12 sps:$4 sm:$0xff]   ;;  %v678_v9 = vld [vmem:[#allocation5 + $0x20] ss:$12 sps:$4 sm:$0xff]   ;;  %v679_v10 = vld [vmem:[#allocation5 + $0x18] ss:$12 sps:$4 sm:$0xff]  }
  0x4d   : > { %592 = vmatprep.subr.bf16.mxu1 %v815_v0  ;;  %333 = vmatprep.subr.bf16.mxu0 %v672_v5  ;;  %v680_v11 = vld [vmem:[#allocation5 + $0x4] ss:$12 sps:$4 sm:$0xff]   ;;  %v682_v12 = vld [vmem:[#allocation5 + $0x8] ss:$12 sps:$4 sm:$0xff]   ;;  %v683_v13 = vld [vmem:[#allocation5] ss:$12 sps:$4 sm:$0xff]  }
  0x4e   : > { %v684_v14 = vld [vmem:[%s966_s8] sm:$0xff]   ;;  %vm409_vm2 = vcmask 1040384   ;;  %vm422_vm3 = vcmask 1046528   ;;  %s560_s24 = sshll.u32 %s962_s5, 4  ;;  %s584_s29 = sshll.u32 %s867_s19, 8 }
  0x4f   : > { %v576_v30 = vld [vmem:[%s1037_s2] ss:$0 sm:$0xff]  ;;  %s230_s12 = scalar_lea.vmem [#allocation7], %s560_s24  ;;  %s990_s20 = scalar_lea.hbm %s1039_s4, %s584_s29 }
  0x50   : > { %593 = vmatpush3.bf16.msra.mxu1 %v674_v6  ;;  %334 = vmatpush1.bf16.msra.mxu0 %v675_v7  ;;  %v577_v34 = vld [vmem:[%s1038_s3] ss:$0 sm:$0xff]  ;;  %s467_s11 = sshll.u32 %s230_s12, 4  ;;  %s454_s25 = scalar_lea.sflag [#allocation4], %s962_s5  ;;  %s992_s11 = int_to_ptr.vmem [resolvable:$true] %s467_s11 }
  0x51   : > { %594 = vmatprep.subr.bf16.mxu1 %v815_v0  ;;  %335 = vmatprep.subr.bf16.mxu0 %v676_v8  ;;  %s739_s30 = scalar_lea.vmem %s992_s11, 256  ;;  %p1055_p11 = scmp.ne.s32.totalorder %s1049_s10, 0 }
  0x52   : > { %p740_p3 = scmp.ne.s32.totalorder %s992_s11, %s739_s30  ;;  %s818_s19 = smov [#allocation7]  }
  0x53   : > { %s743_s6 = sshll.u32 %s818_s19, 4  ;;  %s744_s6 = int_to_ptr.vmem [resolvable:$false] %s743_s6 }
  0x54   : > { %595 = vmatpush3.bf16.msra.mxu1 %v678_v9  ;;  %336 = vmatpush1.bf16.msra.mxu0 %v679_v10  ;;  %p741_p7 = pnand %p740_p3, %p1055_p11  ;;  %s745_s7 = scalar_lea.vmem %s744_s6, 512 }
  0x55   : > { %596 = vmatprep.subr.bf16.mxu1 %v815_v0  ;;  %337 = vmatprep.subr.bf16.mxu0 %v680_v11  ;;  %p746_p10 = scmp.lt.s32.totalorder %s992_s11, %s744_s6  ;;  %p747_p2 = scmp.lt.s32.totalorder %s745_s7, %s739_s30 }
  0x56   : > { %p742_p12 = pneg %p741_p7 }
  0x57   : > { %p748_p13 = por %p747_p2, %p746_p10 }
  0x58   : > { %597 = vmatpush3.bf16.msra.mxu1 %v682_v12  ;;  %338 = vmatpush1.bf16.msra.mxu0 %v683_v13 }
  0x59   : > { %p749_p0 = pnand %p748_p13, %p742_p12 }
  0x5b   : > { %599 = vmatmul.mubr.msk.bf16.vlgmr.msra.gmra.mxu1 %vm319_vm1, %v684_v14  ;;  %574 = vmatmul.mubr.msk.bf16.vlgmr.msra.gmra.mxu0 %vm319_vm1, %v684_v14 }
 0x11b   : > { %v400_v15 = vpop.f32.mrf.mxu1  ;;  %v357_v16 = vpop.f32.mrf.mxu0 }
 0x11c   : > { %v410_v17 = vrot.slane %v357_v16, 7  ;;  %v423_v19 = vrot.slane %v400_v15, 1 }
 0x11d   : > { %v600_v18 = vpop.f32.mrf.mxu1  ;;  %v359_v20 = vpop.f32.mrf.mxu0 }
 0x11e   : > { %v415_v21 = vsel %vm409_vm2, 0.0, %v410_v17 }
 0x11f   : > { %v403_v22 = vpop.f32.mrf.mxu1  ;;  %v418_v23 = vadd.f32 %v415_v21, %v359_v20  ;;  %v361_v25 = vpop.f32.mrf.mxu0 }
 0x120   : > { %v424_v24 = vrot.slane %v403_v22, 1  ;;  %v411_v26 = vrot.slane %v361_v25, 7 }
 0x121   : > { %v601_v27 = vpop.f32.mrf.mxu1  ;;  %v363_v29 = vpop.f32.mrf.mxu0 }
 0x122   : > { %v425_v28 = vsel %vm422_vm3, %v423_v19, %v424_v24  ;;  %v412_v32 = vsel %vm409_vm2, %v410_v17, %v411_v26  ;;  %v428_v35 = vsel %vm422_vm3, %v424_v24, 0.0 }
 0x123   : > { %v429_v31 = vadd.f32 %v425_v28, %v418_v23  ;;  %v419_v33 = vadd.f32 %v412_v32, %v363_v29 }
 0x125   : > { %v438_v36 = vmul.f32 %v576_v30, %v429_v31  ;;  %v430_v37 = vadd.f32 %v428_v35, %v419_v33 }
 0x127   : > { %v447_v38 = vadd.f32 %v577_v34, %v438_v36  ;;  %v439_v39 = vmul.f32 %v576_v30, %v430_v37 }
 0x129   : > { %v449_v40 = vmax.f32 %v447_v38, 0.0  ;;  %v448_v41 = vadd.f32 %v577_v34, %v439_v39 }
 0x12b   : > { %451 = vst [vmem:[%s230_s12] sm:$0xff] %v449_v40  ;;  %v450_v42 = vmax.f32 %v448_v41, 0.0 }
 0x12d   : > { %452 = vst [vmem:[%s230_s12 + $0x8] sm:$0xff] %v450_v42 }
 0x12e   : > { %752 = shalt.err (!%p749_p0)
}
 0x12f   : > { %s753_s8 = scalar_lea.hbm %s990_s20, 256  ;;  %s757_s24 = scalar_lea.hbm %s1039_s4, 512 }
 0x130   : > { %p754_p5 = scmp.ne.s32.totalorder %s990_s20, %s753_s8  ;;  %p758_p4 = scmp.lt.s32.totalorder %s990_s20, %s1039_s4 }
 0x131   : > { %p759_p6 = scmp.lt.s32.totalorder %s757_s24, %s753_s8 }
 0x132   : > { %p755_p9 = pnand %p754_p5, %p1055_p11 }
 0x133   : > { %p760_p8 = por %p759_p6, %p758_p4 }
 0x134   : > { %p756_p1 = pneg %p755_p9 }
 0x136   : > { %p761_p3 = pnand %p760_p8, %p756_p1 }
 0x138   : > { %764 = shalt.err (!%p761_p3)
}
 0x139   : > { %s819_s29 = smov 128   ;;  %s820_s12 = smov 8  }
 0x13a   : > { %608 = dma.vmem_to_hbm [thread:$0]  (%p1055_p11), %s992_s11, 256, %s990_s20, %s454_s25, %s819_s29, %s819_s29, %s820_s12  }
 0x13b PF: > { %s482_s13 = sand.u32 1, %s795_s15   ;;  %p1056_p7 = scmp.ne.s32.totalorder %s1045_s22, 0 }
 0x13c   : > { %p1057_p12 = scmp.ge.s32.totalorder %s807_s18, 2  ;;  %s483_s14 = scalar_lea.sflag [#allocation4], %s482_s13 }
 0x13e   : > { %p619_p10 = pnand %p1057_p12, %p1056_p7 }
 0x140   : > { %p620_p2 = pneg %p619_p10 }
 0x142   : > { %790 = dma.done.wait (%p620_p2), %s483_s14, 256  }
 0x143   : > { %792 = vsyncadd (%p620_p2), %s483_s14, 4294967040  ;;  %p18_p13 = scmp.ge.s32.totalorder %s900_s27, 4   ;;  %s1058_s15 = smov %s799_s16 }
 0x144   : > { %s1059_s16 = smov %s803_s17  ;;  %s1060_s17 = smov %s917_s9 }
 0x145   : > { %s1061_s18 = smov %s900_s27  ;;  %20 = sbr.rel (!%p18_p13) target bundleno = 6 (0x6), region = 85 }
 0x14a   :  { %488 = vsyncpa [#allocation3], 1 }
 0x14b   :  { %490 = vsyncpa [#allocation3 + $0x1], 1 }
 0x14c   :  { %491 = vsyncpa [#allocation6], 1 }
 0x14d   :  { %492 = vsyncpa [#allocation4], 1 }
 0x14e   :  { %494 = vsyncpa [#allocation4 + $0x1], 1 }

</bundles_post_ra>
